<compile_context>
chip_gen: v7x
topology: tpu7x:2x2x1
jax: 0.10.0
libtpu: 0.0.40
codegen_flags: <defaults>
</compile_context>

<pallas_src>
import functools

import jax
import jax.numpy as jnp
from jax.experimental import pallas as pl
from jax.experimental.pallas import tpu as pltpu

# true / padded layer widths
H1, H2, H3, H4 = 200, 100, 50, 10
H1P, H2P, H3P, H4P = 256, 128, 128, 16


def _round_up(n, m):
    return ((n + m - 1) // m) * m


def _device_kind():
    try:
        return jax.devices()[0].device_kind.lower().replace(" ", "")
    except Exception:
        return ""


def _tensorcores_per_chip():
    # v7x has 2 TensorCores per chip; earlier generations have 1.
    kind = _device_kind()
    return 2 if ("v7" in kind or "tpu7" in kind) else 1


def _use_bf16_act():
    # v5e (and older) have no bf16 VPU/EUP -> keep tanh in f32 there.
    kind = _device_kind()
    if not kind:
        return False
    return not any(t in kind for t in ("v2", "v3", "v4", "v5"))


def _xavier_uniform(key, fan_out, fan_in, dtype=jnp.float32):
    # matches torch.nn.init.xavier_uniform_ for a (fan_out, fan_in) weight
    limit = (6.0 / (fan_in + fan_out)) ** 0.5
    return jax.random.uniform(key, (fan_out, fan_in), dtype=dtype,
                              minval=-limit, maxval=limit)


def ffn_kernel(x_ref, w1_ref, b1_ref, w2_ref, b2_ref,
               w3_ref, b3_ref, w4_ref, b4_ref, o_ref, *, bf16_act):
    # fc1 -> tanh -> fc2 -> tanh -> fc3 -> tanh -> fc4
    # (dropout / relu exist on the torch module but are never used in forward())
    cdt = w1_ref.dtype  # bf16 MXU input dtype; accumulation stays f32
    x = x_ref[...].astype(cdt)

    def layer(h, w_ref, b_ref):
        acc = jnp.dot(h, w_ref[...], preferred_element_type=jnp.float32) + b_ref[...]
        if bf16_act:
            # v6e/v7x: bf16 EUP tanh; result already bf16 for the next dot.
            return jnp.tanh(acc.astype(cdt))
        # v5e: f32 tanh, cast only for the next MXU dot.
        return jnp.tanh(acc).astype(cdt)

    h = layer(x, w1_ref, b1_ref)
    h = layer(h, w2_ref, b2_ref)
    h = layer(h, w3_ref, b3_ref)
    o_ref[...] = (jnp.dot(h, w4_ref[...], preferred_element_type=jnp.float32)
                  + b4_ref[...]).astype(o_ref.dtype)


def _choose_batch_tile(B, block_b, num_tc):
    """Pick the batch tile.

    Single-TC chips (v5e/v6e): the grid is a serial loop, so use the largest
    tile that fits (one full-extent tile when possible) -- splitting only adds
    per-step overhead.
    Multi-TC chips (v7x): aim for >= 2 grid steps per TensorCore so both cores
    get work and still pipeline their input/output DMAs.
    """
    if num_tc <= 1 or B <= 16:
        if B <= block_b:
            return B                      # one full-extent tile
        return max(8, (block_b // 8) * 8)
    target_steps = 2 * num_tc
    tb = min(block_b, _round_up(pl.cdiv(B, target_steps), 8))
    tb = min(tb, max(8, (B // 8) * 8))
    return max(8, tb)


def _vmem_limit_bytes(tb, D):
    # double-buffered x / out tiles + resident weights + f32/bf16 intermediates
    est = (2 * tb * D * 4                     # x double buffer (f32)
           + 2 * tb * H4P * 4                 # out double buffer (f32)
           + tb * (H1P + H2P + H3P) * 8       # intermediates (f32 + bf16, generous)
           + (1 << 20))                       # weights/biases + slack
    return int(min(64 * 1024 * 1024, max(32 * 1024 * 1024, est + (8 << 20))))


@functools.partial(jax.jit, static_argnames=("block_b",))
def ffn_forward(x, params, block_b=4096):
    """x: (B, input_size) float32 (bf16 also accepted).
    params: padded, transposed weights/biases (see init_params)."""
    B, D = x.shape
    w1, b1 = params["w1"], params["b1"]   # (D, 256),   (1, 256)
    w2, b2 = params["w2"], params["b2"]   # (256, 128), (1, 128)
    w3, b3 = params["w3"], params["b3"]   # (128, 128), (1, 128)
    w4, b4 = params["w4"], params["b4"]   # (128, 16),  (1, 16)

    num_tc = _tensorcores_per_chip()
    bf16_act = _use_bf16_act()

    tb = _choose_batch_tile(B, block_b, num_tc)
    grid = (pl.cdiv(B, tb),)
    out_dtype = jnp.float32 if x.dtype == jnp.float32 else x.dtype

    # weights/biases: full block, constant index map -> stay resident in VMEM
    full = lambda shape: pl.BlockSpec(shape, lambda i: (0,) * len(shape))

    out_padded = pl.pallas_call(
        functools.partial(ffn_kernel, bf16_act=bf16_act),
        out_shape=jax.ShapeDtypeStruct((B, H4P), out_dtype),
        grid_spec=pltpu.PrefetchScalarGridSpec(
            num_scalar_prefetch=0,
            grid=grid,
            in_specs=[
                pl.BlockSpec((tb, D), lambda i: (i, 0)),   # x tile over batch
                full(w1.shape), full(b1.shape),
                full(w2.shape), full(b2.shape),
                full(w3.shape), full(b3.shape),
                full(w4.shape), full(b4.shape),
            ],
            out_specs=pl.BlockSpec((tb, H4P), lambda i: (i, 0)),
        ),
        compiler_params=pltpu.CompilerParams(
            dimension_semantics=("parallel",),
            vmem_limit_bytes=_vmem_limit_bytes(tb, D),
        ),
    )(x, w1, b1, w2, b2, w3, b3, w4, b4)

    # drop the (now only 6) zero padding lanes of the last layer
    return out_padded[:, :H4]


def init_params(key, input_size, compute_dtype=jnp.bfloat16):
    k1, k2, k3, k4 = jax.random.split(key, 4)
    # torch Linear weight is (out, in); store transposed (in, out) for x @ W
    w1 = _xavier_uniform(k1, H1, input_size).T   # (D, 200)
    w2 = _xavier_uniform(k2, H2, H1).T           # (200, 100)
    w3 = _xavier_uniform(k3, H3, H2).T           # (100, 50)
    w4 = _xavier_uniform(k4, H4, H3).T           # (50, 10)

    def pad(w, rows, cols):
        out = jnp.zeros((rows, cols), jnp.float32)
        return out.at[:w.shape[0], :w.shape[1]].set(w)

    # zero-padded to lane-aligned widths; padded lanes stay exactly zero
    # through tanh (tanh(0)=0, zero bias) and the padded rows of the next
    # layer's weight are zero, so padding is numerically inert.  Weights in
    # bf16 for the MXU, biases stay f32 (added to the f32 accumulator).
    return {
        "w1": pad(w1, input_size, H1P).astype(compute_dtype),
        "b1": jnp.zeros((1, H1P), jnp.float32),
        "w2": pad(w2, H1P, H2P).astype(compute_dtype),
        "b2": jnp.zeros((1, H2P), jnp.float32),
        "w3": pad(w3, H2P, H3P).astype(compute_dtype),
        "b3": jnp.zeros((1, H3P), jnp.float32),
        "w4": pad(w4, H3P, H4P).astype(compute_dtype),
        "b4": jnp.zeros((1, H4P), jnp.float32),
    }


def ffn_reference(x, p, bf16_act):
    # Mirrors the kernel's numerics: bf16 matmul inputs, f32 accumulation,
    # tanh on a bf16-rounded pre-activation on v6e/v7x (f32 on v5e).
    f32, bf = jnp.float32, jnp.bfloat16
    hp = jax.lax.Precision.HIGHEST

    def dot(a, w):
        return jnp.dot(a.astype(bf).astype(f32), w.astype(f32), precision=hp)

    h = x.astype(f32)
    for wi, bi in (("w1", "b1"), ("w2", "b2"), ("w3", "b3")):
        acc = dot(h, p[wi]) + p[bi]
        h = jnp.tanh(acc.astype(bf).astype(f32)) if bf16_act else jnp.tanh(acc)
    o = dot(h, p["w4"]) + p["b4"]
    return o[:, :H4]


if __name__ == "__main__":
    key = jax.random.PRNGKey(0)
    kx, kp = jax.random.split(key)

    batch, input_size = 16, 32
    x = jax.random.normal(kx, (batch, input_size), dtype=jnp.float32)
    params = init_params(kp, input_size)

    out = jax.block_until_ready(ffn_forward(x, params))

    ref = ffn_reference(x, params, _use_bf16_act())
    assert out.shape == (batch, H4), out.shape
    # bf16 matmul inputs / bf16 tanh (on v6e/v7x) -> allow ~1e-2 deviation
    assert jnp.allclose(out, ref, atol=1e-2, rtol=1e-2), (
        "mismatch vs reference, max abs diff = %f"
        % float(jnp.max(jnp.abs(out - ref))))

    print("KERNEL_OK")
</pallas_src>

<mosaic_0001>
module attributes {stable_mosaic.version = 11 : i64} {
  func.func @ffn_kernel(%arg0: i32, %arg1: memref<16x32xf32, #tpu.memory_space<vmem>>, %arg2: memref<32x256xbf16, #tpu.memory_space<vmem>>, %arg3: memref<1x256xf32, #tpu.memory_space<vmem>>, %arg4: memref<256x128xbf16, #tpu.memory_space<vmem>>, %arg5: memref<1x128xf32, #tpu.memory_space<vmem>>, %arg6: memref<128x128xbf16, #tpu.memory_space<vmem>>, %arg7: memref<1x128xf32, #tpu.memory_space<vmem>>, %arg8: memref<128x16xbf16, #tpu.memory_space<vmem>>, %arg9: memref<1x16xf32, #tpu.memory_space<vmem>>, %arg10: memref<16x16xf32, #tpu.memory_space<vmem>>) attributes {dimension_semantics = [#tpu.dimension_semantics<parallel>], iteration_bounds = array<i64: 1>, scalar_prefetch = 0 : i64, scratch_operands = 0 : i64, tpu.core_type = #tpu.core_type<tc>, window_params = [{transform_indices = @transform_0, window_bounds = array<i64: 16, 32>}, {pipeline_mode = #tpu.pipeline_mode<synchronous>, transform_indices = @transform_1, window_bounds = array<i64: 32, 256>}, {pipeline_mode = #tpu.pipeline_mode<synchronous>, transform_indices = @transform_2, window_bounds = array<i64: 1, 256>}, {pipeline_mode = #tpu.pipeline_mode<synchronous>, transform_indices = @transform_3, window_bounds = array<i64: 256, 128>}, {pipeline_mode = #tpu.pipeline_mode<synchronous>, transform_indices = @transform_4, window_bounds = array<i64: 1, 128>}, {pipeline_mode = #tpu.pipeline_mode<synchronous>, transform_indices = @transform_5, window_bounds = array<i64: 128, 128>}, {pipeline_mode = #tpu.pipeline_mode<synchronous>, transform_indices = @transform_6, window_bounds = array<i64: 1, 128>}, {pipeline_mode = #tpu.pipeline_mode<synchronous>, transform_indices = @transform_7, window_bounds = array<i64: 128, 16>}, {pipeline_mode = #tpu.pipeline_mode<synchronous>, transform_indices = @transform_8, window_bounds = array<i64: 1, 16>}, {transform_indices = @transform_9, window_bounds = array<i64: 16, 16>}]} {
    %c0 = arith.constant 0 : index
    %c0_0 = arith.constant 0 : index
    %0 = vector.load %arg1[%c0, %c0_0] : memref<16x32xf32, #tpu.memory_space<vmem>>, vector<16x32xf32>
    %1 = arith.truncf %0 : vector<16x32xf32> to vector<16x32xbf16>
    %c0_1 = arith.constant 0 : index
    %c0_2 = arith.constant 0 : index
    %2 = vector.load %arg2[%c0_1, %c0_2] : memref<32x256xbf16, #tpu.memory_space<vmem>>, vector<32x256xbf16>
    %cst = arith.constant dense<0.000000e+00> : vector<16x256xf32>
    %3 = tpu.matmul %1, %2, %cst {dimension_numbers = #tpu.dot_dimension_numbers<[1], [0], [0], [1], [0, 0, 1, 1], [], []>} : vector<16x32xbf16>, vector<32x256xbf16>, vector<16x256xf32> -> vector<16x256xf32>
    %c0_3 = arith.constant 0 : index
    %c0_4 = arith.constant 0 : index
    %4 = vector.load %arg3[%c0_3, %c0_4] : memref<1x256xf32, #tpu.memory_space<vmem>>, vector<1x256xf32>
    %5 = vector.broadcast %4 : vector<1x256xf32> to vector<16x256xf32>
    %6 = arith.addf %3, %5 : vector<16x256xf32>
    %7 = arith.truncf %6 : vector<16x256xf32> to vector<16x256xbf16>
    %8 = math.tanh %7 : vector<16x256xbf16>
    %c0_5 = arith.constant 0 : index
    %c0_6 = arith.constant 0 : index
    %9 = vector.load %arg4[%c0_5, %c0_6] : memref<256x128xbf16, #tpu.memory_space<vmem>>, vector<256x128xbf16>
    %cst_7 = arith.constant dense<0.000000e+00> : vector<16x128xf32>
    %10 = tpu.matmul %8, %9, %cst_7 {dimension_numbers = #tpu.dot_dimension_numbers<[1], [0], [0], [1], [0, 0, 1, 1], [], []>} : vector<16x256xbf16>, vector<256x128xbf16>, vector<16x128xf32> -> vector<16x128xf32>
    %c0_8 = arith.constant 0 : index
    %c0_9 = arith.constant 0 : index
    %11 = vector.load %arg5[%c0_8, %c0_9] : memref<1x128xf32, #tpu.memory_space<vmem>>, vector<1x128xf32>
    %12 = vector.broadcast %11 : vector<1x128xf32> to vector<16x128xf32>
    %13 = arith.addf %10, %12 : vector<16x128xf32>
    %14 = arith.truncf %13 : vector<16x128xf32> to vector<16x128xbf16>
    %15 = math.tanh %14 : vector<16x128xbf16>
    %c0_10 = arith.constant 0 : index
    %c0_11 = arith.constant 0 : index
    %16 = vector.load %arg6[%c0_10, %c0_11] : memref<128x128xbf16, #tpu.memory_space<vmem>>, vector<128x128xbf16>
    %cst_12 = arith.constant dense<0.000000e+00> : vector<16x128xf32>
    %17 = tpu.matmul %15, %16, %cst_12 {dimension_numbers = #tpu.dot_dimension_numbers<[1], [0], [0], [1], [0, 0, 1, 1], [], []>} : vector<16x128xbf16>, vector<128x128xbf16>, vector<16x128xf32> -> vector<16x128xf32>
    %c0_13 = arith.constant 0 : index
    %c0_14 = arith.constant 0 : index
    %18 = vector.load %arg7[%c0_13, %c0_14] : memref<1x128xf32, #tpu.memory_space<vmem>>, vector<1x128xf32>
    %19 = vector.broadcast %18 : vector<1x128xf32> to vector<16x128xf32>
    %20 = arith.addf %17, %19 : vector<16x128xf32>
    %21 = arith.truncf %20 : vector<16x128xf32> to vector<16x128xbf16>
    %22 = math.tanh %21 : vector<16x128xbf16>
    %c0_15 = arith.constant 0 : index
    %c0_16 = arith.constant 0 : index
    %23 = vector.load %arg8[%c0_15, %c0_16] : memref<128x16xbf16, #tpu.memory_space<vmem>>, vector<128x16xbf16>
    %cst_17 = arith.constant dense<0.000000e+00> : vector<16x16xf32>
    %24 = tpu.matmul %22, %23, %cst_17 {dimension_numbers = #tpu.dot_dimension_numbers<[1], [0], [0], [1], [0, 0, 1, 1], [], []>} : vector<16x128xbf16>, vector<128x16xbf16>, vector<16x16xf32> -> vector<16x16xf32>
    %c0_18 = arith.constant 0 : index
    %c0_19 = arith.constant 0 : index
    %25 = vector.load %arg9[%c0_18, %c0_19] : memref<1x16xf32, #tpu.memory_space<vmem>>, vector<1x16xf32>
    %26 = vector.broadcast %25 : vector<1x16xf32> to vector<16x16xf32>
    %27 = arith.addf %24, %26 : vector<16x16xf32>
    %c0_20 = arith.constant 0 : index
    %c0_21 = arith.constant 0 : index
    %28 = vector.load %arg10[%c0_20, %c0_21] : memref<16x16xf32, #tpu.memory_space<vmem>>, vector<16x16xf32>
    tpu.vector_store %arg10[%c0_20, %c0_21], %27 {strides = array<i32>} : memref<16x16xf32, #tpu.memory_space<vmem>>, vector<16x16xf32>,
    return
  }
  func.func @transform_0(%arg0: i32) -> (i32, i32) {
    %c0_i32 = arith.constant 0 : i32
    %c0_i32_0 = arith.constant 0 : i32
    return %arg0, %c0_i32 : i32, i32
  }
  func.func @transform_1(%arg0: i32) -> (i32, i32) {
    %c0_i32 = arith.constant 0 : i32
    %c0_i32_0 = arith.constant 0 : i32
    %c0_i32_1 = arith.constant 0 : i32
    return %c0_i32, %c0_i32_0 : i32, i32
  }
  func.func @transform_2(%arg0: i32) -> (i32, i32) {
    %c0_i32 = arith.constant 0 : i32
    %c0_i32_0 = arith.constant 0 : i32
    %c0_i32_1 = arith.constant 0 : i32
    return %c0_i32, %c0_i32_0 : i32, i32
  }
  func.func @transform_3(%arg0: i32) -> (i32, i32) {
    %c0_i32 = arith.constant 0 : i32
    %c0_i32_0 = arith.constant 0 : i32
    %c0_i32_1 = arith.constant 0 : i32
    return %c0_i32, %c0_i32_0 : i32, i32
  }
  func.func @transform_4(%arg0: i32) -> (i32, i32) {
    %c0_i32 = arith.constant 0 : i32
    %c0_i32_0 = arith.constant 0 : i32
    %c0_i32_1 = arith.constant 0 : i32
    return %c0_i32, %c0_i32_0 : i32, i32
  }
  func.func @transform_5(%arg0: i32) -> (i32, i32) {
    %c0_i32 = arith.constant 0 : i32
    %c0_i32_0 = arith.constant 0 : i32
    %c0_i32_1 = arith.constant 0 : i32
    return %c0_i32, %c0_i32_0 : i32, i32
  }
  func.func @transform_6(%arg0: i32) -> (i32, i32) {
    %c0_i32 = arith.constant 0 : i32
    %c0_i32_0 = arith.constant 0 : i32
    %c0_i32_1 = arith.constant 0 : i32
    return %c0_i32, %c0_i32_0 : i32, i32
  }
  func.func @transform_7(%arg0: i32) -> (i32, i32) {
    %c0_i32 = arith.constant 0 : i32
    %c0_i32_0 = arith.constant 0 : i32
    %c0_i32_1 = arith.constant 0 : i32
    return %c0_i32, %c0_i32_0 : i32, i32
  }
  func.func @transform_8(%arg0: i32) -> (i32, i32) {
    %c0_i32 = arith.constant 0 : i32
    %c0_i32_0 = arith.constant 0 : i32
    %c0_i32_1 = arith.constant 0 : i32
    return %c0_i32, %c0_i32_0 : i32, i32
  }
  func.func @transform_9(%arg0: i32) -> (i32, i32) {
    %c0_i32 = arith.constant 0 : i32
    %c0_i32_0 = arith.constant 0 : i32
    return %arg0, %c0_i32 : i32, i32
  }
}

</mosaic_0001>

<bundles_post_ra>
// kernel: ffn_forward.1
= control target key start
LH: loop header
LB: loop body
LE: loop exit
PB: predicated region body
PF: predicated region fallthrough
CT: control target
= control target key end

     0   :  { %14 = vsyncpa [#allocation3], 0  ;;  %s1153_s0 = inlined_call_operand.hbm [shape: f32[16,32], index: 0, kind: input, shape index: {}]   ;;  %s1154_s1 = inlined_call_operand.vmem [shape: bf16[32,256], index: 1, kind: input, shape index: {}]   ;;  %s1155_s2 = inlined_call_operand.vmem [shape: f32[1,256], index: 2, kind: input, shape index: {}]   ;;  %s1156_s3 = inlined_call_operand.hbm [shape: bf16[256,128], index: 3, kind: input, shape index: {}]   ;;  %s1157_s4 = inlined_call_operand.hbm [shape: f32[1,128], index: 4, kind: input, shape index: {}]   ;;  %s1158_s5 = inlined_call_operand.vmem [shape: bf16[128,128], index: 5, kind: input, shape index: {}]   ;;  %s1159_s6 = inlined_call_operand.hbm [shape: f32[1,128], index: 6, kind: input, shape index: {}]   ;;  %s1160_s7 = inlined_call_operand.vmem [shape: bf16[128,16], index: 7, kind: input, shape index: {}]   ;;  %s1161_s8 = inlined_call_operand.hbm [shape: f32[1,16], index: 8, kind: input, shape index: {}]   ;;  %s1162_s9 = inlined_call_operand.hbm [shape: f32[16,16], index: 9, kind: output, shape index: {}]  }
   0x1   :  { %15 = vsyncpa [#allocation6], 0 }
   0x2   :  { %16 = vsyncpa [#allocation9], 0 }
   0x3   :  { %17 = vsyncpa [#allocation4], 0  ;;  %s931_s30 = smov [#allocation5]   ;;  %s791_s13 = scalar_lea.hbm %s1156_s3, 2048 }
   0x4   :  { %s39_s10 = sshll.u32 %s931_s30, 4  ;;  %p792_p0 = scmp.ne.s32.totalorder %s1156_s3, %s791_s13  ;;  %s40_s10 = int_to_ptr.vmem [resolvable:$true] %s39_s10 }
   0x5   :  { %p795_p1 = scmp.lt.u32.totalorder %s791_s13, %s1156_s3 }
   0x7   :  { %p797_p2 = pnand %p795_p1, %p792_p0 }
   0x9   :  { %800 = shalt.err (!%p797_p2)
}
   0xa   :  { %s801_s18 = scalar_lea.vmem %s40_s10, 2048  ;;  %p806_p4 = scmp.lt.s32.totalorder %s40_s10, %s40_s10 }
   0xb   :  { %p802_p3 = scmp.ne.s32.totalorder %s40_s10, %s801_s18  ;;  %p807_p5 = scmp.lt.s32.totalorder %s801_s18, %s801_s18 }
   0xd   :  { %p808_p6 = por %p807_p5, %p806_p4 }
   0xf   :  { %p809_p7 = pnand %p808_p6, %p802_p3 }
  0x11   :  { %812 = shalt.err (!%p809_p7)
}
  0x12   :  { %s932_s19 = smov 64   ;;  %s933_s20 = smov 4  }
  0x13   :  { %45 = dma.hbm_to_vmem [thread:$0]  %s1156_s3, 2048, %s40_s10, [#allocation6], %s932_s19, %s932_s19, %s933_s20  }
  0x14   :  { %s934_s23 = smov [#allocation8]   ;;  %s935_s25 = smov [#allocation2]  }
  0x15   :  { %s64_s24 = sshll.u32 %s934_s23, 4  ;;  %s23_s26 = sshll.u32 %s935_s25, 4  ;;  %s65_s24 = int_to_ptr.vmem [resolvable:$true] %s64_s24  ;;  %s24_s26 = int_to_ptr.vmem [resolvable:$true] %s23_s26 }
  0x16   :  { %s813_s29 = scalar_lea.hbm %s1159_s6, 16 }
  0x17   :  { %p814_p8 = scmp.ne.s32.totalorder %s1159_s6, %s813_s29  ;;  %p817_p9 = scmp.lt.u32.totalorder %s813_s29, %s1159_s6 }
  0x19   :  { %p819_p10 = pnand %p817_p9, %p814_p8 }
  0x1b   :  { %822 = shalt.err (!%p819_p10)
}
  0x1c   :  { %s823_s3 = scalar_lea.vmem %s65_s24, 16  ;;  %s827_s10 = scalar_lea.vmem %s65_s24, 32 }
  0x1d   :  { %p824_p11 = scmp.ne.s32.totalorder %s65_s24, %s823_s3  ;;  %p828_p12 = scmp.lt.s32.totalorder %s65_s24, %s65_s24 }
  0x1e   :  { %p829_p13 = scmp.lt.s32.totalorder %s827_s10, %s823_s3 }
  0x20   :  { %p830_p0 = por %p829_p13, %p828_p12 }
  0x22   :  { %p831_p1 = pnand %p830_p0, %p824_p11 }
  0x24   :  { %834 = shalt.err (!%p831_p1)
}
  0x25   :  { %67 = dma.hbm_to_vmem [thread:$0]  %s1159_s6, 16, %s65_s24, [#allocation9]  }
  0x26   :  { %s835_s18 = scalar_lea.hbm %s1153_s0, 256 }
  0x27   :  { %p836_p2 = scmp.ne.s32.totalorder %s1153_s0, %s835_s18  ;;  %p839_p3 = scmp.lt.u32.totalorder %s835_s18, %s1153_s0 }
  0x29   :  { %p841_p4 = pnand %p839_p3, %p836_p2 }
  0x2b   :  { %844 = shalt.err (!%p841_p4)
}
  0x2c   :  { %s845_s23 = scalar_lea.vmem %s24_s26, 256  ;;  %p850_p6 = scmp.lt.s32.totalorder %s24_s26, %s24_s26 }
  0x2d   :  { %p846_p5 = scmp.ne.s32.totalorder %s24_s26, %s845_s23  ;;  %p851_p7 = scmp.lt.s32.totalorder %s845_s23, %s845_s23 }
  0x2f   :  { %p852_p8 = por %p851_p7, %p850_p6 }
  0x31   :  { %p853_p9 = pnand %p852_p8, %p846_p5 }
  0x33   :  { %856 = shalt.err (!%p853_p9)
}
  0x34   :  { %s936_s6 = smov 128   ;;  %s937_s24 = smov 8  }
  0x35   :  { %29 = dma.hbm_to_vmem [thread:$0]  %s1153_s0, 256, %s24_s26, [#allocation3], %s936_s6, %s936_s6, %s937_s24  }
  0x36   :  { %s938_s28 = smov [#allocation7]   ;;  %s939_s30 = smov [#allocation10]  }
  0x37   :  { %s52_s29 = sshll.u32 %s938_s28, 4  ;;  %s76_s11 = sshll.u32 %s939_s30, 4  ;;  %s53_s29 = int_to_ptr.vmem [resolvable:$true] %s52_s29  ;;  %s77_s11 = int_to_ptr.vmem [resolvable:$true] %s76_s11 }
  0x38   :  { %s857_s3 = scalar_lea.hbm %s1157_s4, 16 }
  0x39   :  { %p858_p10 = scmp.ne.s32.totalorder %s1157_s4, %s857_s3  ;;  %p861_p11 = scmp.lt.u32.totalorder %s857_s3, %s1157_s4 }
  0x3b   :  { %p863_p12 = pnand %p861_p11, %p858_p10 }
  0x3d   :  { %866 = shalt.err (!%p863_p12)
}
  0x3e   :  { %s867_s0 = scalar_lea.vmem %s53_s29, 16  ;;  %s871_s26 = scalar_lea.vmem %s53_s29, 32 }
  0x3f   :  { %p868_p13 = scmp.ne.s32.totalorder %s53_s29, %s867_s0  ;;  %p872_p0 = scmp.lt.s32.totalorder %s53_s29, %s53_s29 }
  0x40   :  { %p873_p1 = scmp.lt.s32.totalorder %s871_s26, %s867_s0 }
  0x42   :  { %p874_p2 = por %p873_p1, %p872_p0 }
  0x44   :  { %p875_p3 = pnand %p874_p2, %p868_p13 }
  0x46   :  { %878 = shalt.err (!%p875_p3)
}
  0x47   :  { %55 = dma.hbm_to_vmem [thread:$0]  %s1157_s4, 16, %s53_s29, [#allocation6]  }
  0x48   :  { %s879_s21 = scalar_lea.hbm %s1161_s8, 16 }
  0x49   :  { %p880_p4 = scmp.ne.s32.totalorder %s1161_s8, %s879_s21  ;;  %p883_p5 = scmp.lt.u32.totalorder %s879_s21, %s1161_s8 }
  0x4b   :  { %p885_p6 = pnand %p883_p5, %p880_p4 }
  0x4d   :  { %888 = shalt.err (!%p885_p6)
}
  0x4e   :  { %s889_s28 = scalar_lea.vmem %s77_s11, 16  ;;  %s893_s30 = scalar_lea.vmem %s77_s11, 32 }
  0x4f   :  { %p890_p7 = scmp.ne.s32.totalorder %s77_s11, %s889_s28  ;;  %p894_p8 = scmp.lt.s32.totalorder %s77_s11, %s77_s11 }
  0x50   :  { %p895_p9 = scmp.lt.s32.totalorder %s893_s30, %s889_s28 }
  0x52   :  { %p896_p10 = por %p895_p9, %p894_p8 }
  0x54   :  { %p897_p11 = pnand %p896_p10, %p890_p7 }
  0x56   :  { %900 = shalt.err (!%p897_p11)
}
  0x57   :  { %79 = dma.hbm_to_vmem [thread:$0]  %s1161_s8, 16, %s77_s11, [#allocation9]  }
  0x58   :  { %923 = dma.done.wait [#allocation3], 256  }
  0x59   :  { %924 = vsyncadd [#allocation3], 4294967040 }
  0x5a   :  { %925 = dma.done.wait [#allocation6], 2064  }
  0x5b   :  { %926 = vsyncadd [#allocation6], 4294965232 }
  0x5c   :  { %927 = dma.done.wait [#allocation9], 32  }
  0x5d   :  { %928 = vsyncadd [#allocation9], 4294967264  ;;  %v940_v0 = vmov 0   ;;  %v745_v1 = vld [vmem:[%s1154_s1 + $0x4] ss:$8 sps:$4 sm:$0xff]   ;;  %v751_v7 = vld [vmem:[#allocation5 + $0x40] sm:$0xff]   ;;  %v105_v28 = vlaneseq }
  0x5e   :  { %171 = vmatprep.mubr.bf16.mxu0 %v940_v0  ;;  %v747_v2 = vld [vmem:[%s1154_s1] ss:$8 sps:$4 sm:$0xff]   ;;  %139 = vmatprep.subr.bf16.mxu0 %v745_v1  ;;  %v748_v3 = vld [vmem:[%s1154_s1 + $0x14] ss:$8 sps:$4 sm:$0xff]   ;;  %v750_v4 = vld [vmem:[%s1154_s1 + $0x10] ss:$8 sps:$4 sm:$0xff]  }
  0x5f   :  { %v96_v5 = vld [vmem:[#allocation2] sm:$0xff]  ;;  %140 = vmatpush1.bf16.msra.mxu0 %v747_v2  ;;  %v97_v6 = vld [vmem:[#allocation2 + $0x8] sm:$0xff]  ;;  %v752_v8 = vld [vmem:[#allocation5] sm:$0xff]   ;;  %652 = vmatprep.subr.bf16.mxu1 %v751_v7  ;;  %vm135_vm0 = vcmask 261120   ;;  %v941_v25 = vmov 0.0   ;;  %v106_v29 = vshrl.u32 %v105_v28, 7 }
  0x60   :  { %141 = vmatprep.subr.bf16.mxu0 %v748_v3  ;;  %v98_v9 = vpack.c.bf16 %v97_v6, %v96_v5  ;;  %v753_v10 = vld [vmem:[#allocation5 + $0x48] sm:$0xff]   ;;  %653 = vmatpush3.bf16.msra.mxu1 %v752_v8  ;;  %v755_v12 = vld [vmem:[#allocation5 + $0x50] sm:$0xff]   ;;  %v757_v14 = vld [vmem:[#allocation5 + $0x58] sm:$0xff]   ;;  %vm942_vm1 = vmmov 0   ;;  %vm590_vm2 = vcmask 130048   ;;  %s943_s20 = smov [#allocation11]  }
  0x61   :  { %v754_v11 = vld [vmem:[#allocation5 + $0x8] sm:$0xff]   ;;  %654 = vmatprep.subr.bf16.mxu1 %v753_v10  ;;  %v756_v13 = vld [vmem:[#allocation5 + $0x10] sm:$0xff]   ;;  %v758_v15 = vld [vmem:[#allocation5 + $0x18] sm:$0xff]   ;;  %v107_v30 = vsub.s32 0, %v106_v29  ;;  %v111_v32 = vsub.s32 1, %v106_v29 }
  0x62   :  { %v759_v16 = vld [vmem:[#allocation5 + $0x60] sm:$0xff]   ;;  %v761_v18 = vld [vmem:[#allocation5 + $0x68] sm:$0xff]   ;;  %v763_v20 = vld [vmem:[#allocation5 + $0x70] sm:$0xff]  }
  0x63   :  { %142 = vmatpush1.bf16.msra.mxu0 %v750_v4  ;;  %v760_v17 = vld [vmem:[#allocation5 + $0x20] sm:$0xff]   ;;  %v762_v19 = vld [vmem:[#allocation5 + $0x28] sm:$0xff]   ;;  %v764_v21 = vld [vmem:[#allocation5 + $0x30] sm:$0xff]  }
  0x64   :  { %655 = vmatpush3.bf16.msra.mxu1 %v754_v11  ;;  %v765_v22 = vld [vmem:[#allocation5 + $0x78] sm:$0xff]   ;;  %v767_v24 = vld [vmem:[%s1158_s5] sm:$0xff]   ;;  %692 = vmatprep.subr.bf16.mxu0 %v941_v25  ;;  %v769_v27 = vld [vmem:[%s1158_s5 + $0x10] sm:$0xff]  }
  0x65   :  { %656 = vmatprep.subr.bf16.mxu1 %v755_v12  ;;  %v766_v23 = vld [vmem:[#allocation5 + $0x38] sm:$0xff]   ;;  %v103_v31 = vld [vmem:[%s1155_s2] sm:$0x3]  ;;  %v770_v47 = vld [vmem:[%s1158_s5 + $0x18] sm:$0xff]   ;;  %s598_s2 = sshll.u32 %s943_s20, 4  ;;  %s599_s2 = int_to_ptr.vmem [resolvable:$true] %s598_s2 }
  0x66   :  { %616 = vmatmul.mubr.msk.bf16.vlgmr.msra.gmra.mrb[0].mxu0 %vm135_vm0, %v98_v9  ;;  %v768_v26 = vld [vmem:[%s1158_s5 + $0x8] sm:$0xff]   ;;  %v108_v33 = vrot.slane %v103_v31, %v107_v30  ;;  %v112_v35 = vrot.slane %v103_v31, %v111_v32  ;;  %v771_v48 = vld [vmem:[%s1158_s5 + $0x20] sm:$0xff]   ;;  %v773_v50 = vld [vmem:[%s1158_s5 + $0x30] sm:$0xff]   ;;  %p906_p13 = scmp.lt.s32.totalorder %s599_s2, %s599_s2 }
  0x67   :  { %693 = vmatpush3.bf16.msra.mxu0 %v767_v24  ;;  %v772_v49 = vld [vmem:[%s1158_s5 + $0x28] sm:$0xff]   ;;  %708 = vmatprep.mubr.msk.bf16.mxu0 %vm942_vm1, %v941_v25  ;;  %v774_v51 = vld [vmem:[%s1158_s5 + $0x38] sm:$0xff]   ;;  %v775_v52 = vld [vmem:[%s1160_s7] sm:$0xff]  }
  0x68   :  { %657 = vmatpush3.bf16.msra.mxu1 %v756_v13  ;;  %694 = vmatprep.subr.bf16.mxu0 %v941_v25  ;;  %v776_v53 = vld [vmem:[%s1160_s7 + $0x8] sm:$0xff]   ;;  %v777_v54 = vld [vmem:[%s1160_s7 + $0x10] sm:$0xff]   ;;  %v778_v2 = vld [vmem:[%s1160_s7 + $0x18] sm:$0xff]  }
  0x69   :  { %658 = vmatprep.subr.bf16.mxu1 %v757_v14  ;;  %v617_v59 = vld [vmem:[#allocation7] ss:$0 sm:$0xff]  ;;  %v779_v3 = vld [vmem:[%s1160_s7 + $0x20] sm:$0xff]   ;;  %v780_v4 = vld [vmem:[%s1160_s7 + $0x28] sm:$0xff]  }
  0x6a   :  { %v781_v5 = vld [vmem:[%s1160_s7 + $0x30] sm:$0xff]   ;;  %v782_v6 = vld [vmem:[%s1160_s7 + $0x38] sm:$0xff]   ;;  %s901_s7 = scalar_lea.vmem %s599_s2, 256 }
  0x6b   :  { %695 = vmatpush3.bf16.msra.mxu0 %v768_v26  ;;  %v634_v7 = vld [vmem:[#allocation8] ss:$0 sm:$0xff]  ;;  %p902_p12 = scmp.ne.s32.totalorder %s599_s2, %s901_s7  ;;  %p907_p0 = scmp.lt.s32.totalorder %s901_s7, %s901_s7 }
  0x6c   :  { %659 = vmatpush3.bf16.msra.mxu1 %v758_v15  ;;  %696 = vmatprep.subr.bf16.mxu0 %v941_v25 }
  0x6d   :  { %660 = vmatprep.subr.bf16.mxu1 %v759_v16  ;;  %v643_v16 = vld [vmem:[#allocation10] ss:$0 sm:$0xff]  ;;  %p908_p1 = por %p907_p0, %p906_p13 }
  0x6f   :  { %697 = vmatpush3.bf16.msra.mxu0 %v769_v27  ;;  %p909_p2 = pnand %p908_p1, %p902_p12 }
  0x70   :  { %661 = vmatpush3.bf16.msra.mxu1 %v760_v17  ;;  %698 = vmatprep.subr.bf16.mxu0 %v941_v25 }
  0x71   :  { %662 = vmatprep.subr.bf16.mxu1 %v761_v18 }
  0x73   :  { %699 = vmatpush3.bf16.msra.mxu0 %v770_v47 }
  0x74   :  { %663 = vmatpush3.bf16.msra.mxu1 %v762_v19  ;;  %700 = vmatprep.subr.bf16.mxu0 %v941_v25 }
  0x75   :  { %664 = vmatprep.subr.bf16.mxu1 %v763_v20 }
  0x77   :  { %701 = vmatpush3.bf16.msra.mxu0 %v771_v48 }
  0x78   :  { %665 = vmatpush3.bf16.msra.mxu1 %v764_v21  ;;  %702 = vmatprep.subr.bf16.mxu0 %v941_v25 }
  0x79   :  { %666 = vmatprep.subr.bf16.mxu1 %v765_v22 }
  0x7b   :  { %703 = vmatpush3.bf16.msra.mxu0 %v772_v49 }
  0x7c   :  { %667 = vmatpush3.bf16.msra.mxu1 %v766_v23  ;;  %704 = vmatprep.subr.bf16.mxu0 %v941_v25 }
  0x7d   :  { %712 = vmatprep.subr.bf16.mxu1 %v941_v25 }
  0x7f   :  { %705 = vmatpush3.bf16.msra.mxu0 %v773_v50 }
  0x80   :  { %706 = vmatprep.subr.bf16.mxu0 %v941_v25 }
  0x83   :  { %707 = vmatpush3.bf16.msra.mxu0 %v774_v51 }
 0x139   :  { %v173_v34 = vpop.f32.mrb[0].mxu0 }
 0x13a   :  { %v175_v36 = vpop.f32.mrb[1].mxu0  ;;  %v174_v38 = vadd.f32 %v173_v34, %v108_v33 }
 0x13b   :  { %v177_v37 = vpop.f32.mrb[2].mxu0  ;;  %v176_v41 = vadd.f32 %v175_v36, %v112_v35 }
 0x13c   :  { %v178_v39 = vadd.f32 %v177_v37, %v108_v33  ;;  %v179_v40 = vpop.f32.mrb[3].mxu0 }
 0x13d   :  { %v180_v42 = vadd.f32 %v179_v40, %v112_v35 }
 0x13e   :  { %v182_v43 = vpack.c.bf16 %v178_v39, %v174_v38 }
 0x13f   :  { %v183_v44 = vpack.c.bf16 %v180_v42, %v176_v41 }
 0x141   :  { %783 = vtanh.bf16 %v183_v44 }
 0x142   :  { %785 = vtanh.bf16 %v182_v43 }
 0x14c   :  { %v784_v45 = vpop.eup %783 }
 0x14d   :  { %v786_v46 = vpop.eup %785  ;;  %353 = vmatprep.mubr.bf16.mxu1 %v784_v45 }
 0x14e   :  { %354 = vmatmul.mubr.bf16.vlgmr.msra.gmra.mrb[0].mxu1 %v786_v46 }
 0x14f   :  { %728 = vmatprep.mubr.msk.bf16.mxu1 %vm942_vm1, %v941_v25  ;;  %713 = vmatpush3.bf16.msra.mxu1 %v775_v52 }
 0x150   :  { %714 = vmatprep.subr.bf16.mxu1 %v941_v25 }
 0x153   :  { %715 = vmatpush3.bf16.msra.mxu1 %v776_v53 }
 0x154   :  { %716 = vmatprep.subr.bf16.mxu1 %v941_v25 }
 0x157   :  { %717 = vmatpush3.bf16.msra.mxu1 %v777_v54 }
 0x158   :  { %718 = vmatprep.subr.bf16.mxu1 %v941_v25 }
 0x15b   :  { %719 = vmatpush3.bf16.msra.mxu1 %v778_v2 }
 0x15c   :  { %720 = vmatprep.subr.bf16.mxu1 %v941_v25 }
 0x15f   :  { %721 = vmatpush3.bf16.msra.mxu1 %v779_v3 }
 0x160   :  { %722 = vmatprep.subr.bf16.mxu1 %v941_v25 }
 0x163   :  { %723 = vmatpush3.bf16.msra.mxu1 %v780_v4 }
 0x164   :  { %724 = vmatprep.subr.bf16.mxu1 %v941_v25 }
 0x167   :  { %725 = vmatpush3.bf16.msra.mxu1 %v781_v5 }
 0x168   :  { %726 = vmatprep.subr.bf16.mxu1 %v941_v25 }
 0x16b   :  { %727 = vmatpush3.bf16.msra.mxu1 %v782_v6 }
 0x221   :  { %v668_v55 = vpop.f32.mrb[0].mxu1 }
 0x222   :  { %v669_v56 = vpop.f32.mrb[1].mxu1 }
 0x223   :  { %v670_v57 = vadd.f32 %v669_v56, %v668_v55  ;;  %v671_v58 = vpop.f32.mrb[2].mxu1 }
 0x224   :  { %v672_v60 = vpop.f32.mrb[3].mxu1 }
 0x225   :  { %v673_v61 = vadd.f32 %v672_v60, %v671_v58  ;;  %v356_v62 = vadd.f32 %v670_v57, %v617_v59 }
 0x227   :  { %v359_v63 = vadd.f32 %v673_v61, %v617_v59 }
 0x229   :  { %v362_v0 = vpack.c.bf16 %v359_v63, %v356_v62 }
 0x22b   :  { %787 = vtanh.bf16 %v362_v0 }
 0x236   :  { %v788_v1 = vpop.eup %787 }
 0x237   :  { %709 = vmatmul.mubr.bf16.vlgmr.msra.gmra.mrb[4].mxu0 %v788_v1 }
 0x30a   :  { %v469_v8 = vpop.f32.mrb[4].mxu0 }
 0x30b   :  { %v710_v9 = vpop.f32.mrb[5].mxu0  ;;  %v470_v11 = vadd.f32 %v634_v7, %v469_v8 }
 0x30c   :  { %v472_v10 = vpop.f32.mrb[6].mxu0 }
 0x30d   :  { %v473_v12 = vadd.f32 %v634_v7, %v472_v10  ;;  %v711_v13 = vpop.f32.mrb[7].mxu0 }
 0x30f   :  { %v476_v14 = vpack.c.bf16 %v473_v12, %v470_v11 }
 0x311   :  { %789 = vtanh.bf16 %v476_v14 }
 0x31c   :  { %v790_v15 = vpop.eup %789 }
 0x31d   :  { %729 = vmatmul.mubr.bf16.vlgmr.msra.gmra.mrb[4].mxu1 %v790_v15 }
 0x3f0   :  { %v583_v17 = vpop.f32.mrb[4].mxu1 }
 0x3f1   :  { %v584_v18 = vadd.f32 %v643_v16, %v583_v17  ;;  %v730_v19 = vpop.f32.mrb[5].mxu1 }
 0x3f2   :  { %v586_v20 = vpop.f32.mrb[6].mxu1 }
 0x3f3   :  { %v587_v21 = vadd.f32 %v643_v16, %v586_v20  ;;  %v731_v22 = vpop.f32.mrb[7].mxu1  ;;  %591 = vst.msk [vmem:[#allocation11] sm:$0xff] %vm590_vm2, %v584_v18 }
 0x3f5   :  { %592 = vst.msk [vmem:[#allocation11 + $0x8] sm:$0xff] %vm590_vm2, %v587_v21 }
 0x3f6   :  { %912 = shalt.err (!%p909_p2)
}
 0x3f7   :  { %s913_s23 = scalar_lea.hbm %s1162_s9, 256 }
 0x3f8   :  { %p914_p3 = scmp.ne.s32.totalorder %s1162_s9, %s913_s23  ;;  %p917_p4 = scmp.lt.u32.totalorder %s913_s23, %s1162_s9 }
 0x3fa   :  { %p919_p5 = pnand %p917_p4, %p914_p3 }
 0x3fc   :  { %922 = shalt.err (!%p919_p5)
}
 0x3fd   :  { %604 = dma.vmem_to_hbm [thread:$0]  %s599_s2, 256, %s1162_s9, [#allocation4], %s936_s6, %s936_s6, %s937_s24  }
 0x3fe   :  { %929 = dma.done.wait [#allocation4], 256  }
 0x3ff   :  { %930 = vsyncadd [#allocation4], 4294967040 }
 0x400   :  { %608 = vsyncpa [#allocation3], 1 }
 0x401   :  { %609 = vsyncpa [#allocation6], 1 }
 0x402   :  { %610 = vsyncpa [#allocation9], 1 }
 0x403   :  { %611 = vsyncpa [#allocation4], 1 }

</bundles_post_ra>
